<compile_context>
chip_gen: v6e
topology: v6e:2x2x1
jax: 0.10.0
libtpu: 0.0.40
codegen_flags: <defaults>
</compile_context>

<pallas_src>
import functools

import jax
import jax.numpy as jnp
from jax.experimental import pallas as pl
from jax.experimental.pallas import tpu as pltpu


def _bn_affine_kernel(scale_ref, bias_ref, x_ref, o_ref, *, tile_rows):
    # scale_ref / bias_ref: (rows_pad, 1) f32, whole column resident in VMEM
    # x_ref / o_ref:        (tile_rows, HW) tile of the (N*C, H*W) view
    r0 = pl.multiple_of(pl.program_id(0) * tile_rows, tile_rows)
    scale = scale_ref[pl.ds(r0, tile_rows), :]
    bias = bias_ref[pl.ds(r0, tile_rows), :]
    o_ref[...] = (x_ref[...].astype(jnp.float32) * scale + bias).astype(o_ref.dtype)


def _round_up(a, b):
    return pl.cdiv(a, b) * b


def _vmem_capacity_bytes():
    try:
        return int(pltpu.get_tpu_info().vmem_capacity_bytes)
    except Exception:  # pragma: no cover - conservative fallback
        return 128 << 20  # v5e / v6e physical VMEM


@functools.partial(jax.jit, static_argnames=("eps",))
def _bn_apply(x_nchw, gamma, beta, running_mean, running_var, *, eps=1e-5):
    """Eval-mode BatchNorm2d on an NCHW tensor via a Pallas affine kernel."""
    n, c, h, w = x_nchw.shape
    hw = h * w
    rows = n * c
    itemsize = jnp.dtype(x_nchw.dtype).itemsize
    sublane = max(8, 32 // itemsize)  # 8 f32, 16 bf16, 32 int8/fp8

    # ---- fold BN into per-channel scale / bias, expand to per-row ----------
    inv_std = 1.0 / jnp.sqrt(running_var.astype(jnp.float32) + eps)
    scale_c = gamma.astype(jnp.float32) * inv_std                    # (C,)
    bias_c = beta.astype(jnp.float32) - running_mean.astype(jnp.float32) * scale_c
    scale_rows = jnp.tile(scale_c, n).reshape(rows, 1)               # row = n_idx*C + c_idx
    bias_rows = jnp.tile(bias_c, n).reshape(rows, 1)

    # ---- pure reshape view of NCHW (no transpose, no pad, no slice) --------
    x2d = x_nchw.reshape(rows, hw)                                   # (N*C, H*W)

    # ---- tile sizing from the VMEM budget -----------------------------------
    vmem_cap = _vmem_capacity_bytes()
    vmem_limit = min(64 << 20, max(32 << 20, vmem_cap // 2))         # 64MiB v5e/v6e, 32MiB v7x
    tile_budget = max(1 << 20, vmem_limit // 5)                      # in+out double-buffered ~4x
    bytes_per_row = max(hw * itemsize, 1)
    tile_rows = max(sublane, (tile_budget // bytes_per_row) // sublane * sublane)

    if rows >= 2 * sublane:
        # Guarantee >= 2 grid blocks so v7x's second TensorCore gets work
        # (no-op on v5e/v6e, and no-op when the budget already splits finer).
        half = _round_up(pl.cdiv(rows, 2), sublane)
        tile_rows = min(tile_rows, half)
    else:
        # Tiny input: one block spanning all rows (block dim == full dim is
        # always legal, even when rows % 8 != 0).
        tile_rows = min(tile_rows, rows)

    num_blocks = pl.cdiv(rows, tile_rows)
    rows_pad = num_blocks * tile_rows

    # Pad only the tiny (rows,1) scale/bias columns so the in-kernel pl.ds
    # slice never reads past their VMEM buffer on the partial final block.
    if rows_pad != rows:
        scale_rows = jnp.pad(scale_rows, ((0, rows_pad - rows), (0, 0)))
        bias_rows = jnp.pad(bias_rows, ((0, rows_pad - rows), (0, 0)))

    cost = pl.CostEstimate(
        flops=2 * rows * hw,
        transcendentals=0,
        bytes_accessed=2 * rows * hw * itemsize + 2 * rows_pad * 4,
    )

    out2d = pl.pallas_call(
        functools.partial(_bn_affine_kernel, tile_rows=tile_rows),
        out_shape=jax.ShapeDtypeStruct((rows, hw), x_nchw.dtype),
        grid_spec=pltpu.PrefetchScalarGridSpec(
            num_scalar_prefetch=0,
            grid=(num_blocks,),
            in_specs=[
                # Constant index_map: fetched once, VMEM-resident afterwards.
                pl.BlockSpec((rows_pad, 1), lambda i: (0, 0)),
                pl.BlockSpec((rows_pad, 1), lambda i: (0, 0)),
                pl.BlockSpec((tile_rows, hw), lambda i: (i, 0)),
            ],
            out_specs=pl.BlockSpec((tile_rows, hw), lambda i: (i, 0)),
        ),
        compiler_params=pltpu.CompilerParams(
            dimension_semantics=("parallel",),
            vmem_limit_bytes=vmem_limit,
        ),
        cost_estimate=cost,
    )(scale_rows, bias_rows, x2d)

    return out2d.reshape(n, c, h, w)


def quan_bn_forward(x_nchw, bn_params, n_bit, *, eps=1e-5):
    """Forward of the PyTorch `quan_bn` module.

    bn_params: {2: {...}, 4: {...}, 8: {...}} each with gamma/beta/mean/var,
    mirroring the module's bn2/bn4/bn8.  `n_bit` picks which BN is applied,
    exactly like `get_bit_bn`.
    """
    if n_bit not in (2, 4, 8):
        raise NotImplementedError(f"unsupported n_bit={n_bit}")
    p = bn_params[n_bit]
    return _bn_apply(x_nchw, p["gamma"], p["beta"], p["mean"], p["var"], eps=eps)


def _reference(x, gamma, beta, mean, var, eps=1e-5):
    inv_std = 1.0 / jnp.sqrt(var + eps)
    return ((x - mean[None, :, None, None]) * (gamma * inv_std)[None, :, None, None]
            + beta[None, :, None, None])


def _make_bn_params(keys, dim):
    bn_params = {}
    for idx, bit in enumerate((2, 4, 8)):
        kg, kb, km, kv = keys[4 * idx: 4 * idx + 4]
        bn_params[bit] = dict(
            gamma=1.0 + 0.1 * jax.random.normal(kg, (dim,), dtype=jnp.float32),
            beta=0.1 * jax.random.normal(kb, (dim,), dtype=jnp.float32),
            mean=0.05 * jax.random.normal(km, (dim,), dtype=jnp.float32),
            var=1.0 + 0.1 * jnp.abs(jax.random.normal(kv, (dim,), dtype=jnp.float32)),
        )
    return bn_params


if __name__ == "__main__":
    key = jax.random.PRNGKey(0)
    keys = jax.random.split(key, 26)

    # ---- primary test: batch=2, channels(dim)=4, spatial=16 ----------------
    N, DIM, HW = 2, 4, 16
    x = jax.random.normal(keys[0], (N, DIM, HW, HW), dtype=jnp.float32)
    bn_params = _make_bn_params(keys[1:13], DIM)

    n_bit = 4  # search_space_sample['quantization'][0]
    out = quan_bn_forward(x, bn_params, n_bit)
    out = jax.block_until_ready(out)

    p = bn_params[n_bit]
    ref = _reference(x, p["gamma"], p["beta"], p["mean"], p["var"])
    assert out.shape == (N, DIM, HW, HW), out.shape
    assert jnp.allclose(out, ref, atol=1e-5, rtol=1e-5), "mismatch vs reference (test 1)"

    # ---- secondary test: rows not a multiple of the tile and HW % 128 != 0 --
    # rows = 5*5 = 25 -> tile_rows = 16, grid = 2 with a partial final block;
    # hw = 14*14 = 196 -> masked lane tail.  Validates the un-padded path.
    N2, DIM2, HW2 = 5, 5, 14
    x2 = jax.random.normal(keys[13], (N2, DIM2, HW2, HW2), dtype=jnp.float32)
    bn_params2 = _make_bn_params(keys[14:26], DIM2)
    out2 = quan_bn_forward(x2, bn_params2, 8)
    out2 = jax.block_until_ready(out2)
    p2 = bn_params2[8]
    ref2 = _reference(x2, p2["gamma"], p2["beta"], p2["mean"], p2["var"])
    assert out2.shape == (N2, DIM2, HW2, HW2), out2.shape
    assert jnp.allclose(out2, ref2, atol=1e-5, rtol=1e-5), "mismatch vs reference (test 2)"

    print("KERNEL_OK")
</pallas_src>

<mosaic_0001>
module attributes {stable_mosaic.version = 11 : i64} {
  func.func @_bn_affine_kernel(%arg0: i32, %arg1: memref<8x1xf32, #tpu.memory_space<vmem>>, %arg2: memref<8x1xf32, #tpu.memory_space<vmem>>, %arg3: memref<8x256xf32, #tpu.memory_space<vmem>>, %arg4: memref<8x256xf32, #tpu.memory_space<vmem>>) attributes {dimension_semantics = [#tpu.dimension_semantics<parallel>], iteration_bounds = array<i64: 1>, scalar_prefetch = 0 : i64, scratch_operands = 0 : i64, tpu.core_type = #tpu.core_type<tc>, window_params = [{pipeline_mode = #tpu.pipeline_mode<synchronous>, transform_indices = @transform_0, window_bounds = array<i64: 8, 1>}, {pipeline_mode = #tpu.pipeline_mode<synchronous>, transform_indices = @transform_1, window_bounds = array<i64: 8, 1>}, {transform_indices = @transform_2, window_bounds = array<i64: 8, 256>}, {transform_indices = @transform_3, window_bounds = array<i64: 8, 256>}]} {
    %c8_i32 = arith.constant 8 : i32
    %0 = arith.muli %arg0, %c8_i32 : i32
    %1 = tpu.assume_multiple %0, 8 : i32
    %2 = arith.index_cast %1 : i32 to index
    %c0 = arith.constant 0 : index
    %3 = vector.load %arg1[%2, %c0] : memref<8x1xf32, #tpu.memory_space<vmem>>, vector<8x1xf32>
    %4 = arith.index_cast %1 : i32 to index
    %c0_0 = arith.constant 0 : index
    %5 = vector.load %arg2[%4, %c0_0] : memref<8x1xf32, #tpu.memory_space<vmem>>, vector<8x1xf32>
    %c0_1 = arith.constant 0 : index
    %c0_2 = arith.constant 0 : index
    %6 = vector.load %arg3[%c0_1, %c0_2] : memref<8x256xf32, #tpu.memory_space<vmem>>, vector<8x256xf32>
    %7 = vector.broadcast %3 : vector<8x1xf32> to vector<8x256xf32>
    %8 = arith.mulf %6, %7 : vector<8x256xf32>
    %9 = vector.broadcast %5 : vector<8x1xf32> to vector<8x256xf32>
    %10 = arith.addf %8, %9 : vector<8x256xf32>
    %c0_3 = arith.constant 0 : index
    %c0_4 = arith.constant 0 : index
    %11 = vector.load %arg4[%c0_3, %c0_4] : memref<8x256xf32, #tpu.memory_space<vmem>>, vector<8x256xf32>
    tpu.vector_store %arg4[%c0_3, %c0_4], %10 {strides = array<i32>} : memref<8x256xf32, #tpu.memory_space<vmem>>, vector<8x256xf32>,
    return
  }
  func.func @transform_0(%arg0: i32) -> (i32, i32) {
    %c0_i32 = arith.constant 0 : i32
    %c0_i32_0 = arith.constant 0 : i32
    %c0_i32_1 = arith.constant 0 : i32
    return %c0_i32, %c0_i32_0 : i32, i32
  }
  func.func @transform_1(%arg0: i32) -> (i32, i32) {
    %c0_i32 = arith.constant 0 : i32
    %c0_i32_0 = arith.constant 0 : i32
    %c0_i32_1 = arith.constant 0 : i32
    return %c0_i32, %c0_i32_0 : i32, i32
  }
  func.func @transform_2(%arg0: i32) -> (i32, i32) {
    %c0_i32 = arith.constant 0 : i32
    %c0_i32_0 = arith.constant 0 : i32
    return %arg0, %c0_i32 : i32, i32
  }
  func.func @transform_3(%arg0: i32) -> (i32, i32) {
    %c0_i32 = arith.constant 0 : i32
    %c0_i32_0 = arith.constant 0 : i32
    return %arg0, %c0_i32 : i32, i32
  }
}

</mosaic_0001>

<bundles_post_ra>
// kernel: tile.0
= control target key start
LH: loop header
LB: loop body
LE: loop exit
PB: predicated region body
PF: predicated region fallthrough
CT: control target
= control target key end

     0   :  { %s35_s8 = smov 125   ;;  %vm8_vm0 = vcmask 7168   ;;  %s36_s11 = smov 126   ;;  %s62_s0 = inlined_call_operand.vmem [shape: f32[2,4], index: 0, kind: input, shape index: {}]   ;;  %s63_s1 = inlined_call_operand.vmem [shape: f32[8,1], index: 1, kind: output, shape index: {}]  }
   0x1   :  { %v5_v0 = vld [vmem:[%s62_s0] sm:$0x3]  ;;  %s34_s0 = smov 127  }
   0x2   :  { %6 = vst [vmem:[#allocation0] sm:$0x3] %v5_v0 }
   0x9   :  { %v10_v1 = vld [vmem:[#allocation0] sm:$0x3]  }
   0xa   :  { %v22_v2 = vld [vmem:[#allocation0] sm:$0x3]   ;;  %11 = vrot.lane.b32.xlu0 %v10_v1, %s34_s0 }
   0xb   :  { %23 = vrot.lane.b32.xlu1 %v22_v2, %s35_s8  ;;  %v7_v3 = vld [vmem:[#allocation0] sm:$0x3]  }
   0xc   :  { %v16_v4 = vld [vmem:[#allocation0] sm:$0x3]   ;;  %9 = vst.msk [vmem:[%s63_s1] ss:$4 sm:$0x3] %vm8_vm0, %v7_v3  }
   0xe   :  { %17 = vrot.lane.b32.xlu0 %v16_v4, %s36_s11 }
  0x7c   :  { %v12_v5 = vpop.permute.xlu0 %11  }
  0x7d   :  { %v24_v6 = vpop.permute.xlu1 %23   ;;  %28 = vst.msk [vmem:[%s63_s1 + $0x1] ss:$4 sm:$0x3] %vm8_vm0, %v12_v5  }
  0x7e   :  { %30 = vst.msk [vmem:[%s63_s1 + $0x3] ss:$4 sm:$0x3] %vm8_vm0, %v24_v6  }
  0x80   :  { %v18_v7 = vpop.permute.xlu0 %17  }
  0x81   :  { %29 = vst.msk [vmem:[%s63_s1 + $0x2] ss:$4 sm:$0x3] %vm8_vm0, %v18_v7  }

// kernel: tile.18
= control target key start
LH: loop header
LB: loop body
LE: loop exit
PB: predicated region body
PF: predicated region fallthrough
CT: control target
= control target key end

     0   :  { %s22_s0 = inlined_call_operand.vmem [shape: f32[4], index: 0, kind: input, shape index: {}]   ;;  %s23_s1 = inlined_call_operand.vmem [shape: f32[2,4], index: 1, kind: output, shape index: {}]  }
   0x1   :  { %v4_v0 = vld [vmem:[%s22_s0] ss:$0 sm:$0xff] }
   0x2   :  { %5 = vst [vmem:[%s23_s1] sm:$0x3] %v4_v0 }

// kernel: _bn_apply.1
= control target key start
LH: loop header
LB: loop body
LE: loop exit
PB: predicated region body
PF: predicated region fallthrough
CT: control target
= control target key end

     0   :  { %v43_v0 = vmov 0   ;;  %s82_s0 = inlined_call_operand.vmem [shape: f32[8,1], index: 0, kind: input, shape index: {}]   ;;  %s83_s1 = inlined_call_operand.vmem [shape: f32[8,1], index: 1, kind: input, shape index: {}]   ;;  %s84_s2 = inlined_call_operand.vmem [shape: f32[8,256], index: 2, kind: input, shape index: {}]   ;;  %s85_s3 = inlined_call_operand.vmem [shape: f32[8,256], index: 3, kind: output, shape index: {}]  }
   0x1   :  { %42 = vset.pattern.permute.xlu0 %v43_v0  ;;  %v16_v1 = vld [vmem:[%s82_s0] sm:$0xff]  ;;  %v20_v4 = vld [vmem:[%s84_s2 + $0x8] sm:$0xff] }
   0x2   :  { %23 = vperm.xlu0 %42, %v16_v1   ;;  %v18_v2 = vld [vmem:[%s83_s1] sm:$0xff] }
   0x3   :  { %v19_v3 = vld [vmem:[%s84_s2] sm:$0xff] }
   0x6   :  { %30 = vperm.xlu0 %42, %v18_v2  }
  0x7d   :  { %v24_v5 = vpop.permute.xlu0 %23 }
  0x7e   :  { %v26_v6 = vmul.f32 %v24_v5, %v19_v3  ;;  %v27_v7 = vmul.f32 %v24_v5, %v20_v4 }
  0x81   :  { %v31_v8 = vpop.permute.xlu0 %30 }
  0x82   :  { %v33_v9 = vadd.f32 %v31_v8, %v26_v6  ;;  %v34_v10 = vadd.f32 %v31_v8, %v27_v7 }
  0x84   :  { %35 = vst [vmem:[%s85_s3] sm:$0xff] %v33_v9  ;;  %36 = vst [vmem:[%s85_s3 + $0x8] sm:$0xff] %v34_v10 }

</bundles_post_ra>
